<compile_context>
chip_gen: v7x
topology: tpu7x:2x2x1
jax: 0.10.0
libtpu: 0.0.40
codegen_flags: <defaults>
</compile_context>

<pallas_src>
import jax
import jax.numpy as jnp
import numpy as np
from jax.experimental import pallas as pl
from jax.experimental.pallas import tpu as pltpu


def _cdiv(a, b):
    return -(-a // b)


def _round_up(a, m):
    return ((a + m - 1) // m) * m


def _per_row_loss(x_raw, t_raw, w_raw):
    """Per-row reweighted CE loss for one (TN, C) tile. Returns (TN, 1) f32."""
    x = x_raw.astype(jnp.float32)          # (TN, C) logits
    t = t_raw.astype(jnp.float32)          # (TN, C) targets
    w = w_raw.astype(jnp.float32)          # (1, C) learnable weights
    tn, c = x.shape
    col = jax.lax.broadcasted_iota(jnp.int32, (tn, c), 1)

    # rel = argmax(target[:, 1:]) + 1 (first occurrence): 2 XLU reductions.
    neg_big = jnp.float32(-3.0e38)
    t_rel = jnp.where(col >= 1, t, neg_big)
    relmax = jnp.max(t_rel, axis=1, keepdims=True)                    # (TN,1)
    rel_idx = jnp.min(jnp.where((t_rel == relmax) & (col >= 1), col, c),
                      axis=1, keepdims=True)                          # (TN,1)

    # cls = argmax(target) (first occurrence) derived WITHOUT extra XLU
    # reductions: argmax == 0 iff t[:,0] >= max(t[:,1:]), else it's rel_idx.
    t0 = t[:, 0:1]                                                    # (TN,1)
    cls_idx = jnp.where(t0 >= relmax, 0, rel_idx)                     # (TN,1)

    # gather W[rel] with a boolean-masked lane reduce (no float one-hot mult)
    w_sel = jnp.sum(jnp.where(col == rel_idx, w, 0.0),
                    axis=1, keepdims=True)                            # (TN,1)

    # per-sample weight: 1.0 for rows with target[:,0]==1, else -W[rel]
    row_w = jnp.where(t0 == 1.0, 1.0, -w_sel)

    # -log_softmax(x)[i, cls_i] = logsumexp(x_i) - x_i[cls_i]
    xmax = jnp.max(x, axis=1, keepdims=True)
    lse = jnp.log(jnp.sum(jnp.exp(x - xmax), axis=1, keepdims=True)) + xmax
    sel_logit = jnp.sum(jnp.where(col == cls_idx, x, 0.0),
                        axis=1, keepdims=True)
    return (lse - sel_logit) * row_w                                  # (TN,1)


def _rowloss_kernel(x_ref, t_ref, w_ref, loss_ref):
    # reduction='none' path: per-row losses; out-of-bounds rows of the ragged
    # last block are discarded by Pallas on writeback.
    loss_ref[...] = _per_row_loss(x_ref[...], t_ref[...], w_ref[...])


def _make_sum_kernel(n_valid, tn):
    # reduction='sum'/'mean' path: one (8,1) partial-sum block per tile, with
    # the tile's masked loss sum in element [0,0] and zeros elsewhere.
    def kernel(x_ref, t_ref, w_ref, psum_ref):
        loss = _per_row_loss(x_ref[...], t_ref[...], w_ref[...])      # (tn,1)
        row = (jax.lax.broadcasted_iota(jnp.int32, (tn, 1), 0)
               + pl.program_id(0) * tn)
        loss = jnp.where(row < n_valid, loss, 0.0)   # mask ragged-edge garbage
        total = jnp.sum(loss, axis=0, keepdims=True)                  # (1,1)
        sub = jax.lax.broadcasted_iota(jnp.int32, (8, 1), 0)
        psum_ref[...] = jnp.where(sub == 0, total, 0.0)               # (8,1)
    return kernel


def reweighting_ce_with_lw(logits, target, weights, reduction='mean',
                           block_rows=4096):
    if reduction not in ('none', 'sum', 'mean'):
        raise ValueError(
            'unrecognized option, expect reduction to be one of none, mean, sum')

    N, C = logits.shape

    # Row tile: multiple of 8, capped at block_rows; also capped at cdiv(N,4)
    # so large problems split into >=4 tiles (v7x megacore needs >=2 tiles on
    # the "parallel" axis).  No wrapper-side padding: ragged last tile is
    # handled by Pallas (inputs) and in-kernel masking (partial sums).
    tn = min(block_rows, _cdiv(N, 4))
    tn = _round_up(max(tn, 8), 8)
    num_tiles = _cdiv(N, tn)

    # Native dtype goes straight in (bf16 halves HBM traffic); upcast happens
    # in-register inside the kernel.
    w2d = weights.reshape(1, C)

    in_specs = [
        pl.BlockSpec((tn, C), lambda i: (i, 0)),
        pl.BlockSpec((tn, C), lambda i: (i, 0)),
        pl.BlockSpec((1, C), lambda i: (0, 0)),
    ]
    compiler_params = pltpu.CompilerParams(
        dimension_semantics=("parallel",),
        # Covers double-buffered input blocks plus the f32 tile temporaries at
        # tn=4096 (~26 MiB estimated); headroom under v7x's 64 MiB/TC.
        vmem_limit_bytes=48 * 1024 * 1024,
    )
    bytes_in = int(N * C * (logits.dtype.itemsize + target.dtype.itemsize)
                   + C * weights.dtype.itemsize)

    if reduction == 'none':
        cost = pl.CostEstimate(flops=int(12 * N * C),
                               transcendentals=int(N * C),
                               bytes_accessed=bytes_in + 4 * N)
        loss = pl.pallas_call(
            _rowloss_kernel,
            grid=(num_tiles,),
            in_specs=in_specs,
            out_specs=pl.BlockSpec((tn, 1), lambda i: (i, 0)),
            out_shape=jax.ShapeDtypeStruct((N, 1), jnp.float32),
            compiler_params=compiler_params,
            cost_estimate=cost,
        )(logits, target, w2d)
        # TODO(synk): if the 'none' path becomes hot, emit a lane-dense
        # (num_tiles, tn) slab instead of (N, 1) to avoid masked vst.msk.
        return loss[:, 0]

    # 'sum' / 'mean': per-tile partial sums only.
    cost = pl.CostEstimate(flops=int(12 * N * C),
                           transcendentals=int(N * C),
                           bytes_accessed=bytes_in + 32 * num_tiles)
    psum = pl.pallas_call(
        _make_sum_kernel(N, tn),
        grid=(num_tiles,),
        in_specs=in_specs,
        out_specs=pl.BlockSpec((8, 1), lambda i: (i, 0)),
        out_shape=jax.ShapeDtypeStruct((num_tiles * 8, 1), jnp.float32),
        compiler_params=compiler_params,
        cost_estimate=cost,
    )(logits, target, w2d)
    total = jnp.sum(psum)
    if reduction == 'sum':
        return total
    return total / N    # mean


def _reference(logits, target, weights, reduction='mean'):
    # Pure-JAX re-implementation of the PyTorch forward for verification.
    logits = logits.astype(jnp.float32)
    target = target.astype(jnp.float32)
    cls = jnp.argmax(target, axis=1)
    rel = jnp.argmax(target[:, 1:], axis=1) + 1
    row_w = jnp.where(target[:, 0] == 1.0, 1.0, -weights[rel])
    logp = jax.nn.log_softmax(logits, axis=1)
    onehot = jax.nn.one_hot(cls, target.shape[1], dtype=logits.dtype)
    loss = jnp.sum(-logp * onehot, axis=1) * row_w
    if reduction == 'mean':
        return jnp.mean(loss)
    elif reduction == 'sum':
        return jnp.sum(loss)
    return loss


def _make_inputs(key, n, c):
    k1, k2, k3, k4 = jax.random.split(key, 4)
    logits = jax.random.normal(k1, (n, c), jnp.float32)
    lw = jax.random.normal(k2, (c,), jnp.float32)  # stand-in for nn.Parameter
    labels = jax.random.randint(k3, (n,), 1, c)
    fg_w = jax.random.uniform(k4, (n,), minval=0.1, maxval=0.9)
    is_bg = (jnp.arange(n) % 2 == 0)
    # even rows: background [1, 0, ...]; odd rows: foreground [w, 0, .., 1, ..]
    target = jnp.zeros((n, c), jnp.float32)
    target = target.at[jnp.arange(n), labels].set(jnp.where(is_bg, 0.0, 1.0))
    target = target.at[jnp.arange(n), 0].set(jnp.where(is_bg, 1.0, fg_w))
    return logits, target, lw


if __name__ == "__main__":
    C = 51  # dim=51 as in the module __init__
    key = jax.random.PRNGKey(0)
    kA, kB, kC = jax.random.split(key, 3)

    # case 1: small batch, single tile
    logits, target, lw = _make_inputs(kA, 8, C)
    for red in ("mean", "sum", "none"):
        out = jax.block_until_ready(
            reweighting_ce_with_lw(logits, target, lw, reduction=red))
        ref = _reference(logits, target, lw, reduction=red)
        np.testing.assert_allclose(np.asarray(out), np.asarray(ref),
                                   rtol=1e-5, atol=1e-5)

    # case 2: batch not a multiple of 8 (ragged last block, no wrapper pad)
    logits, target, lw = _make_inputs(kB, 13, C)
    for red in ("mean", "sum", "none"):
        out = jax.block_until_ready(
            reweighting_ce_with_lw(logits, target, lw, reduction=red))
        ref = _reference(logits, target, lw, reduction=red)
        np.testing.assert_allclose(np.asarray(out), np.asarray(ref),
                                   rtol=1e-5, atol=1e-5)

    # case 3: multi-tile grid (4 tiles) with ragged edge + partial-sum path
    logits, target, lw = _make_inputs(kC, 50, C)
    for red in ("mean", "sum", "none"):
        out = jax.block_until_ready(
            reweighting_ce_with_lw(logits, target, lw, reduction=red))
        ref = _reference(logits, target, lw, reduction=red)
        np.testing.assert_allclose(np.asarray(out), np.asarray(ref),
                                   rtol=1e-5, atol=1e-5)

    print("KERNEL_OK")
</pallas_src>

<mosaic_0001>
module attributes {stable_mosaic.version = 11 : i64} {
  func.func @kernel(%arg0: i32, %arg1: memref<8x51xf32, #tpu.memory_space<vmem>>, %arg2: memref<8x51xf32, #tpu.memory_space<vmem>>, %arg3: memref<1x51xf32, #tpu.memory_space<vmem>>, %arg4: memref<8x1xf32, #tpu.memory_space<vmem>>) attributes {dimension_semantics = [#tpu.dimension_semantics<parallel>], iteration_bounds = array<i64: 1>, scalar_prefetch = 0 : i64, scratch_operands = 0 : i64, tpu.core_type = #tpu.core_type<tc>, window_params = [{transform_indices = @transform_0, window_bounds = array<i64: 8, 51>}, {transform_indices = @transform_1, window_bounds = array<i64: 8, 51>}, {pipeline_mode = #tpu.pipeline_mode<synchronous>, transform_indices = @transform_2, window_bounds = array<i64: 1, 51>}, {transform_indices = @transform_3, window_bounds = array<i64: 8, 1>}]} {
    %c0 = arith.constant 0 : index
    %c0_0 = arith.constant 0 : index
    %0 = vector.load %arg1[%c0, %c0_0] : memref<8x51xf32, #tpu.memory_space<vmem>>, vector<8x51xf32>
    %c0_1 = arith.constant 0 : index
    %c0_2 = arith.constant 0 : index
    %1 = vector.load %arg2[%c0_1, %c0_2] : memref<8x51xf32, #tpu.memory_space<vmem>>, vector<8x51xf32>
    %c0_3 = arith.constant 0 : index
    %c0_4 = arith.constant 0 : index
    %2 = vector.load %arg3[%c0_3, %c0_4] : memref<1x51xf32, #tpu.memory_space<vmem>>, vector<1x51xf32>
    %3 = tpu.iota {dimensions = array<i32: 1>} : vector<8x51xi32>
    %c1_i32 = arith.constant 1 : i32
    %4 = vector.broadcast %c1_i32 : i32 to vector<8x51xi32>
    %5 = arith.cmpi sge, %3, %4 : vector<8x51xi32>
    %cst = arith.constant -3.000000e+38 : f32
    %6 = vector.broadcast %cst : f32 to vector<8x51xf32>
    %7 = arith.select %5, %1, %6 : vector<8x51xi1>, vector<8x51xf32>
    %cst_5 = arith.constant dense<0xFF800000> : vector<8xf32>
    %8 = vector.multi_reduction <maximumf>, %7, %cst_5 [1] : vector<8x51xf32> to vector<8xf32>
    %9 = vector.shape_cast %8 : vector<8xf32> to vector<8x1xf32>
    %10 = vector.broadcast %9 : vector<8x1xf32> to vector<8x51xf32>
    %11 = arith.cmpf oeq, %7, %10 : vector<8x51xf32>
    %c1_i32_6 = arith.constant 1 : i32
    %12 = vector.broadcast %c1_i32_6 : i32 to vector<8x51xi32>
    %13 = arith.cmpi sge, %3, %12 : vector<8x51xi32>
    %14 = arith.andi %11, %13 : vector<8x51xi1>
    %c51_i32 = arith.constant 51 : i32
    %15 = vector.broadcast %c51_i32 : i32 to vector<8x51xi32>
    %16 = arith.select %14, %3, %15 : vector<8x51xi1>, vector<8x51xi32>
    %cst_7 = arith.constant dense<2147483647> : vector<8xi32>
    %17 = vector.multi_reduction <minsi>, %16, %cst_7 [1] : vector<8x51xi32> to vector<8xi32>
    %18 = vector.shape_cast %17 : vector<8xi32> to vector<8x1xi32>
    %19 = vector.extract_strided_slice %1 {offsets = [0, 0], sizes = [8, 1], strides = [1, 1]} : vector<8x51xf32> to vector<8x1xf32>
    %20 = arith.cmpf oge, %19, %9 : vector<8x1xf32>
    %c0_i32 = arith.constant 0 : i32
    %21 = vector.broadcast %c0_i32 : i32 to vector<8x1xi32>
    %22 = arith.select %20, %21, %18 : vector<8x1xi1>, vector<8x1xi32>
    %23 = vector.broadcast %18 : vector<8x1xi32> to vector<8x51xi32>
    %24 = arith.cmpi eq, %3, %23 : vector<8x51xi32>
    %cst_8 = arith.constant 0.000000e+00 : f32
    %25 = vector.shape_cast %2 : vector<1x51xf32> to vector<1x51xf32>
    %26 = vector.broadcast %25 : vector<1x51xf32> to vector<8x51xf32>
    %27 = vector.broadcast %cst_8 : f32 to vector<8x51xf32>
    %28 = arith.select %24, %26, %27 : vector<8x51xi1>, vector<8x51xf32>
    %cst_9 = arith.constant dense<0.000000e+00> : vector<8xf32>
    %29 = vector.multi_reduction <add>, %28, %cst_9 [1] : vector<8x51xf32> to vector<8xf32>
    %30 = vector.shape_cast %29 : vector<8xf32> to vector<8x1xf32>
    %cst_10 = arith.constant 1.000000e+00 : f32
    %31 = vector.broadcast %cst_10 : f32 to vector<8x1xf32>
    %32 = arith.cmpf oeq, %19, %31 : vector<8x1xf32>
    %cst_11 = arith.constant 0.000000e+00 : f32
    %33 = vector.broadcast %cst_11 : f32 to vector<8x1xf32>
    %34 = arith.subf %33, %30 : vector<8x1xf32>
    %cst_12 = arith.constant 1.000000e+00 : f32
    %35 = vector.broadcast %cst_12 : f32 to vector<8x1xf32>
    %36 = arith.select %32, %35, %34 : vector<8x1xi1>, vector<8x1xf32>
    %cst_13 = arith.constant dense<0xFF800000> : vector<8xf32>
    %37 = vector.multi_reduction <maximumf>, %0, %cst_13 [1] : vector<8x51xf32> to vector<8xf32>
    %38 = vector.shape_cast %37 : vector<8xf32> to vector<8x1xf32>
    %39 = vector.broadcast %38 : vector<8x1xf32> to vector<8x51xf32>
    %40 = arith.subf %0, %39 : vector<8x51xf32>
    %41 = math.exp %40 : vector<8x51xf32>
    %cst_14 = arith.constant dense<0.000000e+00> : vector<8xf32>
    %42 = vector.multi_reduction <add>, %41, %cst_14 [1] : vector<8x51xf32> to vector<8xf32>
    %43 = vector.shape_cast %42 : vector<8xf32> to vector<8x1xf32>
    %44 = math.log %43 : vector<8x1xf32>
    %45 = arith.addf %44, %38 : vector<8x1xf32>
    %46 = vector.broadcast %22 : vector<8x1xi32> to vector<8x51xi32>
    %47 = arith.cmpi eq, %3, %46 : vector<8x51xi32>
    %cst_15 = arith.constant 0.000000e+00 : f32
    %48 = vector.broadcast %cst_15 : f32 to vector<8x51xf32>
    %49 = arith.select %47, %0, %48 : vector<8x51xi1>, vector<8x51xf32>
    %cst_16 = arith.constant dense<0.000000e+00> : vector<8xf32>
    %50 = vector.multi_reduction <add>, %49, %cst_16 [1] : vector<8x51xf32> to vector<8xf32>
    %51 = vector.shape_cast %50 : vector<8xf32> to vector<8x1xf32>
    %52 = arith.subf %45, %51 : vector<8x1xf32>
    %53 = arith.mulf %52, %36 : vector<8x1xf32>
    %54 = tpu.iota {dimensions = array<i32: 0>} : vector<8x1xi32>
    %c8_i32 = arith.constant 8 : i32
    %55 = arith.muli %arg0, %c8_i32 : i32
    %56 = vector.broadcast %55 : i32 to vector<8x1xi32>
    %57 = arith.addi %54, %56 : vector<8x1xi32>
    %c8_i32_17 = arith.constant 8 : i32
    %58 = vector.broadcast %c8_i32_17 : i32 to vector<8x1xi32>
    %59 = arith.cmpi slt, %57, %58 : vector<8x1xi32>
    %cst_18 = arith.constant 0.000000e+00 : f32
    %60 = vector.broadcast %cst_18 : f32 to vector<8x1xf32>
    %61 = arith.select %59, %53, %60 : vector<8x1xi1>, vector<8x1xf32>
    %cst_19 = arith.constant dense<0.000000e+00> : vector<1xf32>
    %62 = vector.multi_reduction <add>, %61, %cst_19 [0] : vector<8x1xf32> to vector<1xf32>
    %63 = vector.shape_cast %62 : vector<1xf32> to vector<1x1xf32>
    %64 = tpu.iota {dimensions = array<i32: 0>} : vector<8x1xi32>
    %c0_i32_20 = arith.constant 0 : i32
    %65 = vector.broadcast %c0_i32_20 : i32 to vector<8x1xi32>
    %66 = arith.cmpi eq, %64, %65 : vector<8x1xi32>
    %cst_21 = arith.constant 0.000000e+00 : f32
    %67 = vector.shape_cast %63 : vector<1x1xf32> to vector<1x1xf32>
    %68 = vector.broadcast %67 : vector<1x1xf32> to vector<8x1xf32>
    %69 = vector.broadcast %cst_21 : f32 to vector<8x1xf32>
    %70 = arith.select %66, %68, %69 : vector<8x1xi1>, vector<8x1xf32>
    %c0_22 = arith.constant 0 : index
    %c0_23 = arith.constant 0 : index
    %71 = vector.load %arg4[%c0_22, %c0_23] : memref<8x1xf32, #tpu.memory_space<vmem>>, vector<8x1xf32>
    tpu.vector_store %arg4[%c0_22, %c0_23], %70 {strides = array<i32>} : memref<8x1xf32, #tpu.memory_space<vmem>>, vector<8x1xf32>,
    return
  }
  func.func @transform_0(%arg0: i32) -> (i32, i32) {
    %c0_i32 = arith.constant 0 : i32
    %c0_i32_0 = arith.constant 0 : i32
    return %arg0, %c0_i32 : i32, i32
  }
  func.func @transform_1(%arg0: i32) -> (i32, i32) {
    %c0_i32 = arith.constant 0 : i32
    %c0_i32_0 = arith.constant 0 : i32
    return %arg0, %c0_i32 : i32, i32
  }
  func.func @transform_2(%arg0: i32) -> (i32, i32) {
    %c0_i32 = arith.constant 0 : i32
    %c0_i32_0 = arith.constant 0 : i32
    %c0_i32_1 = arith.constant 0 : i32
    return %c0_i32, %c0_i32_0 : i32, i32
  }
  func.func @transform_3(%arg0: i32) -> (i32, i32) {
    %c0_i32 = arith.constant 0 : i32
    %c0_i32_0 = arith.constant 0 : i32
    return %arg0, %c0_i32 : i32, i32
  }
}

</mosaic_0001>

<bundles_post_ra>
// kernel: tpu_custom_call.1
= control target key start
LH: loop header
LB: loop body
LE: loop exit
PB: predicated region body
PF: predicated region fallthrough
CT: control target
= control target key end

     0   :  { %8 = vsyncpa [#allocation3], 0  ;;  %s247_s0 = inlined_call_operand.hbm [shape: f32[8,51], index: 0, kind: input, shape index: {}]   ;;  %s248_s1 = inlined_call_operand.hbm [shape: f32[8,51], index: 1, kind: input, shape index: {}]   ;;  %s249_s2 = inlined_call_operand.vmem [shape: f32[1,51], index: 2, kind: input, shape index: {}]   ;;  %s250_s3 = inlined_call_operand.vmem [shape: f32[8,1], index: 3, kind: output, shape index: {}]  }
   0x1   :  { %9 = vsyncpa [#allocation5], 0  ;;  %s186_s12 = smov [#allocation2]   ;;  %s187_s14 = smov [#allocation4]  }
   0x2   :  { %s16_s13 = sshll.u32 %s186_s12, 4  ;;  %s26_s15 = sshll.u32 %s187_s14, 4  ;;  %s17_s13 = int_to_ptr.vmem [resolvable:$true] %s16_s13  ;;  %s27_s15 = int_to_ptr.vmem [resolvable:$true] %s26_s15 }
   0x3   :  { %s138_s18 = scalar_lea.hbm %s247_s0, 128 }
   0x4   :  { %p139_p0 = scmp.ne.s32.totalorder %s247_s0, %s138_s18  ;;  %p142_p1 = scmp.lt.u32.totalorder %s138_s18, %s247_s0 }
   0x6   :  { %p144_p2 = pnand %p142_p1, %p139_p0 }
   0x8   :  { %147 = shalt.err (!%p144_p2)
}
   0x9   :  { %s148_s23 = scalar_lea.vmem %s17_s13, 128  ;;  %p153_p4 = scmp.lt.s32.totalorder %s17_s13, %s17_s13 }
   0xa   :  { %p149_p3 = scmp.ne.s32.totalorder %s17_s13, %s148_s23  ;;  %p154_p5 = scmp.lt.s32.totalorder %s148_s23, %s148_s23 }
   0xc   :  { %p155_p6 = por %p154_p5, %p153_p4 }
   0xe   :  { %p156_p7 = pnand %p155_p6, %p149_p3 }
  0x10   :  { %159 = shalt.err (!%p156_p7)
}
  0x11   :  { %19 = dma.hbm_to_vmem [thread:$0]  %s247_s0, 128, %s17_s13, [#allocation3]  }
  0x12   :  { %s160_s28 = scalar_lea.hbm %s248_s1, 128 }
  0x13   :  { %p161_p8 = scmp.ne.s32.totalorder %s248_s1, %s160_s28  ;;  %p164_p9 = scmp.lt.u32.totalorder %s160_s28, %s248_s1 }
  0x15   :  { %p166_p10 = pnand %p164_p9, %p161_p8 }
  0x17   :  { %169 = shalt.err (!%p166_p10)
}
  0x18   :  { %s170_s6 = scalar_lea.vmem %s27_s15, 128  ;;  %p175_p12 = scmp.lt.s32.totalorder %s27_s15, %s27_s15 }
  0x19   :  { %p171_p11 = scmp.ne.s32.totalorder %s27_s15, %s170_s6  ;;  %p176_p13 = scmp.lt.s32.totalorder %s170_s6, %s170_s6 }
  0x1b   :  { %p177_p0 = por %p176_p13, %p175_p12 }
  0x1d   :  { %p178_p1 = pnand %p177_p0, %p171_p11 }
  0x1f   :  { %181 = shalt.err (!%p178_p1)
}
  0x20   :  { %29 = dma.hbm_to_vmem [thread:$0]  %s248_s1, 128, %s27_s15, [#allocation5]  }
  0x21   :  { %182 = dma.done.wait [#allocation3], 128  }
  0x22   :  { %183 = vsyncadd [#allocation3], 4294967168 }
  0x23   :  { %184 = dma.done.wait [#allocation5], 128  }
  0x24   :  { %185 = vsyncadd [#allocation5], 4294967168  ;;  %v41_v0 = vlaneseq  ;;  %vm45_vm1 = vcmask 416768   ;;  %v39_v2 = vld [vmem:[#allocation4] sm:$0xff]  ;;  %v38_v13 = vld [vmem:[#allocation2] sm:$0xff]  ;;  %v188_v16 = vmov 0  }
  0x25   :  { %v83_v15 = vsel %vm45_vm1, %v38_v13, -inf  ;;  %133 = vset.pattern.permute.xlu0 %v188_v16  ;;  %v129_v26 = vld [vmem:[%s249_s2] ss:$0 sm:$0xff]  ;;  %vm80_vm8 = vcmp.eq.f32.partialorder %v39_v2, 1.0  ;;  %vm112_vm9 = vcmask 7168  }
  0x26   :  { %v42_v1 = vand.u32 127, %v41_v0  ;;  %v106_v48 = vshrl.u32 %v41_v0, 7 }
  0x28   :  { %vm43_vm0 = vcmp.ge.s32.totalorder %v42_v1, 1  ;;  %vm120_vm10 = vcmp.eq.s32.totalorder %v106_v48, 0 }
  0x29   :  { %v44_v3 = vsel %vm43_vm0, %v39_v2, -3e+38 }
  0x2a   :  { %v46_v4 = vsel %vm45_vm1, %v44_v3, -inf }
  0x2b   :  { %47 = vmax.xlane.f32.xlu0 %v46_v4 }
  0xb8   :  { %v48_v5 = vpop.xlane.xlu0 %47 }
  0xb9   :  { %vm49_vm2 = vcmp.eq.f32.partialorder %v44_v3, %v48_v5  ;;  %vm67_vm5 = vcmp.ge.f32.partialorder %v39_v2, %v48_v5 }
  0xba   :  { %vm50_vm3 = vmand %vm49_vm2, %vm43_vm0 }
  0xbb   :  { %v51_v6 = vsel %vm50_vm3, %v42_v1, 51 }
  0xbc   :  { %v52_v7 = vsel %vm45_vm1, %v51_v6, 2147483647 }
  0xbd   :  { %v54_v8 = vshra.s32 %v52_v7, 16  ;;  %v53_v10 = vand.u32 65535, %v52_v7 }
  0xbf   :  { %v56_v9 = vcvt.s32.f32 %v54_v8  ;;  %v55_v12 = vcvt.s32.f32 %v53_v10 }
  0xc1   :  { %57 = vmin.xlane.f32.xlu0 %v56_v9 }
 0x14e   :  { %v58_v11 = vpop.xlane.xlu0 %57 }
 0x14f   :  { %vm59_vm4 = vcmp.eq.f32.partialorder %v56_v9, %v58_v11  ;;  %v64_v17 = vcvt.f32.s32 %v58_v11 }
 0x150   :  { %v60_v14 = vsel %vm59_vm4, %v55_v12, inf }
 0x151   :  { %61 = vmin.xlane.f32.xlu1 %v60_v14  ;;  %v65_v19 = vshll.u32 %v64_v17, 16 }
 0x155   :  { %84 = vmax.xlane.f32.xlu1 %v83_v15 }
 0x1de   :  { %v62_v18 = vpop.xlane.xlu1 %61 }
 0x1df   :  { %v63_v20 = vcvt.f32.s32 %v62_v18 }
 0x1e1   :  { %v66_v21 = vadd.s32 %v65_v19, %v63_v20 }
 0x1e2   :  { %v85_v22 = vpop.xlane.xlu1 %84 }
 0x1e3   :  { %v86_v23 = vsub.f32 %v38_v13, %v85_v22  ;;  %v68_v24 = vsel %vm67_vm5, 0, %v66_v21  ;;  %vm69_vm6 = vcmp.eq.s32.totalorder %v42_v1, %v66_v21 }
 0x1e4   :  { %96 = vperm.xlu0 %133, %v68_v24   ;;  %v76_v29 = vsel %vm69_vm6, %v129_v26, 0.0 }
 0x1e5   :  { %v87_v25 = vmul.f32 1.442695, %v86_v23  ;;  %v77_v30 = vsel %vm45_vm1, %v76_v29, 0.0 }
 0x1e7   :  { %134 = vpow2.f32 %v87_v25 }
 0x1f1   :  { %v135_v27 = vpop.eup %134 }
 0x1f2   :  { %v89_v28 = vsel %vm45_vm1, %v135_v27, 0.0 }
 0x1f3   :  { %90 = vadd.xlane.f32.xlu1 %v89_v28 }
 0x1f7   :  { %78 = vadd.xlane.f32.xlu1 %v77_v30 }
 0x263   :  { %v97_v31 = vpop.permute.xlu0 %96 }
 0x264   :  { %vm98_vm7 = vcmp.eq.s32.totalorder %v42_v1, %v97_v31 }
 0x265   :  { %v99_v32 = vsel %vm98_vm7, %v38_v13, 0.0 }
 0x266   :  { %v100_v33 = vsel %vm45_vm1, %v99_v32, 0.0 }
 0x267   :  { %101 = vadd.xlane.f32.xlu1 %v100_v33 }
 0x280   :  { %v91_v34 = vpop.xlane.xlu1 %90 }
 0x281   :  { %136 = vlog2.f32 %v91_v34 }
 0x284   :  { %v79_v37 = vpop.xlane.xlu1 %78 }
 0x285   :  { %v81_v38 = vsub.f32 0.0, %v79_v37 }
 0x287   :  { %v82_v42 = vsel %vm80_vm8, 1.0, %v81_v38 }
 0x28b   :  { %v137_v35 = vpop.eup %136 }
 0x28c   :  { %v93_v36 = vmul.f32 0.6931472, %v137_v35 }
 0x28e   :  { %v94_v39 = vadd.f32 %v93_v36, %v85_v22 }
 0x2f4   :  { %v102_v40 = vpop.xlane.xlu1 %101 }
 0x2f5   :  { %v103_v41 = vsub.f32 %v94_v39, %v102_v40 }
 0x2f7   :  { %v104_v43 = vmul.f32 %v103_v41, %v82_v42 }
 0x2f9   :  { %v113_v44 = vsel %vm112_vm9, %v104_v43, 0.0 }
 0x2fa   :  { %v114_v45 = vrot.slane %v113_v44, 4 }
 0x2fc   :  { %v115_v46 = vadd.f32 %v114_v45, %v113_v44 }
 0x2fe   :  { %v116_v47 = vrot.slane %v115_v46, 2 }
 0x300   :  { %v117_v49 = vadd.f32 %v116_v47, %v115_v46 }
 0x302   :  { %v118_v50 = vrot.slane %v117_v49, 1 }
 0x304   :  { %v119_v51 = vadd.f32 %v118_v50, %v117_v49 }
 0x306   :  { %v121_v52 = vsel %vm120_vm10, %v119_v51, 0.0 }
 0x307   :  { %122 = vst.msk [vmem:[%s250_s3] sm:$0xff] %vm112_vm9, %v121_v52 }
 0x308   :  { %127 = vsyncpa [#allocation3], 1 }
 0x309   :  { %128 = vsyncpa [#allocation5], 1 }

</bundles_post_ra>
